<compile_context>
chip_gen: v7x
topology: tpu7x:2x2x1
jax: 0.10.0
libtpu: 0.0.40
codegen_flags: <defaults>
</compile_context>

<pallas_src>
import functools
import math

import jax
import jax.numpy as jnp
from jax import lax
from jax.experimental import pallas as pl
from jax.experimental.pallas import tpu as pltpu

LANE = 128
_DEFAULT_TILE = 256   # q/kv tile: fits v5e's 16 MiB scoped-VMEM default and
                      # fills the 256-wide MXU on v6e/v7x for the PV matmul.


def _ceil_to(x, m):
    return ((x + m - 1) // m) * m


def _vmem_limit_bytes(working_set_bytes):
    # 2x headroom over the estimated double-buffered working set, floored at
    # 32 MiB, capped at 48 MiB (safe below v7x's 64 MiB physical VMEM).
    return int(min(max(2 * working_set_bytes + (8 << 20), 32 << 20), 48 << 20))


# ---------------------------------------------------------------------------
# Kernel 1: fused, pre-scaled QKV projection over flattened (B*S, E) rows.
# ---------------------------------------------------------------------------
def _qkv_proj_kernel(x_ref, w_ref, b_ref, q_ref, k_ref, v_ref, *, hp):
    # x_ref: (tr, E) bf16 ; w_ref: (E, 3*hp) bf16 ; b_ref: (1, 3*hp) f32
    # q/k/v_ref: (tr, hp) bf16.  1/sqrt(head_dim) is pre-folded into the Q slab.
    qkv = jnp.dot(x_ref[...], w_ref[...],
                  preferred_element_type=jnp.float32) + b_ref[...]
    q_ref[...] = qkv[:, 0 * hp:1 * hp].astype(q_ref.dtype)
    k_ref[...] = qkv[:, 1 * hp:2 * hp].astype(k_ref.dtype)
    v_ref[...] = qkv[:, 2 * hp:3 * hp].astype(v_ref.dtype)


def _qkv_project(x_rows, w_qkv, b_qkv, *, hp, row_tile):
    rows, e_dim = x_rows.shape
    n_row_tiles = rows // row_tile

    ws = (2 * row_tile * e_dim * 2        # x block (double-buffered, bf16)
          + 2 * e_dim * 3 * hp * 2        # W block
          + 2 * 3 * hp * 4                # bias block
          + 3 * 2 * row_tile * hp * 2)    # q/k/v output blocks
    params = pltpu.CompilerParams(dimension_semantics=("parallel",),
                                  vmem_limit_bytes=_vmem_limit_bytes(ws))
    out_shape = tuple(jax.ShapeDtypeStruct((rows, hp), jnp.bfloat16)
                      for _ in range(3))
    kernel = functools.partial(_qkv_proj_kernel, hp=hp)

    def call(single_buffer_weights):
        if single_buffer_weights:
            # Constant index_map -> data only needs one DMA per pallas_call;
            # single-buffering frees VMEM for bigger row tiles.
            w_spec = pl.BlockSpec((e_dim, 3 * hp), lambda r: (0, 0),
                                  pipeline_mode=pl.Buffered(1))
            b_spec = pl.BlockSpec((1, 3 * hp), lambda r: (0, 0),
                                  pipeline_mode=pl.Buffered(1))
        else:
            w_spec = pl.BlockSpec((e_dim, 3 * hp), lambda r: (0, 0))
            b_spec = pl.BlockSpec((1, 3 * hp), lambda r: (0, 0))
        return pl.pallas_call(
            kernel,
            out_shape=out_shape,
            grid_spec=pltpu.PrefetchScalarGridSpec(
                num_scalar_prefetch=0,
                grid=(n_row_tiles,),
                in_specs=[
                    pl.BlockSpec((row_tile, e_dim), lambda r: (r, 0)),
                    w_spec,
                    b_spec,
                ],
                out_specs=[
                    pl.BlockSpec((row_tile, hp), lambda r: (r, 0)),
                    pl.BlockSpec((row_tile, hp), lambda r: (r, 0)),
                    pl.BlockSpec((row_tile, hp), lambda r: (r, 0)),
                ],
            ),
            compiler_params=params,
        )(x_rows, w_qkv, b_qkv)

    try:
        return call(True)
    except Exception:
        # pipeline_mode / Buffered(1) not supported by this JAX build:
        # fall back to default double-buffered weight blocks.
        return call(False)


# ---------------------------------------------------------------------------
# Kernel 2: flash-style (online-softmax) single-head attention.
# ---------------------------------------------------------------------------
def _flash_attn_kernel(q_ref, k_ref, v_ref, o_ref, m_scr, l_scr, acc_scr,
                       *, head_dim, kv_len, need_kv_mask):
    # q_ref: (tq, hp) bf16 (scale pre-folded); k_ref/v_ref: (tk, hp) bf16
    # o_ref: (tq, head_dim) f32; scratch: m/l (tq, 1) f32, acc (tq, hp) f32
    ki = pl.program_id(2)

    @pl.when(ki == 0)
    def _():
        m_scr[...] = jnp.full_like(m_scr, -jnp.inf)
        l_scr[...] = jnp.zeros_like(l_scr)
        acc_scr[...] = jnp.zeros_like(acc_scr)

    # scores = q @ k^T, contracting the last (lane) dims of both operands —
    # MXU-native NT layout, no explicit XLU transpose of K.
    s = lax.dot_general(q_ref[...], k_ref[...],
                        dimension_numbers=(((1,), (1,)), ((), ())),
                        preferred_element_type=jnp.float32)      # (tq, tk)

    if need_kv_mask:
        col = ki * s.shape[1] + lax.broadcasted_iota(jnp.int32, s.shape, 1)
        s = jnp.where(col < kv_len, s, -jnp.inf)

    # Online softmax in f32 (portable to v5e: no bf16 VPU/EUP there).
    m_prev = m_scr[...]
    m_new = jnp.maximum(m_prev, jnp.max(s, axis=-1, keepdims=True))
    alpha = jnp.exp(m_prev - m_new)
    p = jnp.exp(s - m_new)
    l_scr[...] = alpha * l_scr[...] + jnp.sum(p, axis=-1, keepdims=True)
    acc_scr[...] = alpha * acc_scr[...] + jnp.dot(
        p.astype(jnp.bfloat16), v_ref[...], preferred_element_type=jnp.float32)
    m_scr[...] = m_new

    @pl.when(ki == pl.num_programs(2) - 1)
    def _():
        # Exact divide (review parity concern) and only the true head_dim
        # columns are written back -> no 8x-padded output slab in HBM.
        out = acc_scr[...] / l_scr[...]
        o_ref[...] = out[:, :head_dim].astype(o_ref.dtype)


def _flash_attention(q, k, v, *, head_dim, kv_len, tq, tk):
    b_dim, s_pad, hp = q.shape
    n_q = s_pad // tq
    n_kv = s_pad // tk
    need_kv_mask = kv_len != s_pad

    ws = (2 * tq * hp * 2 + 2 * 2 * tk * hp * 2 + 2 * tq * head_dim * 4
          + 2 * tq * 4 + tq * hp * 4 + 2 * tq * tk * 4)
    params = pltpu.CompilerParams(
        dimension_semantics=("parallel", "parallel", "arbitrary"),
        vmem_limit_bytes=_vmem_limit_bytes(ws))

    kernel = functools.partial(_flash_attn_kernel, head_dim=head_dim,
                               kv_len=kv_len, need_kv_mask=need_kv_mask)

    return pl.pallas_call(
        kernel,
        out_shape=jax.ShapeDtypeStruct((b_dim, s_pad, head_dim), jnp.float32),
        grid_spec=pltpu.PrefetchScalarGridSpec(
            num_scalar_prefetch=0,
            grid=(b_dim, n_q, n_kv),
            in_specs=[
                pl.BlockSpec((None, tq, hp), lambda b, qi, ki: (b, qi, 0)),
                pl.BlockSpec((None, tk, hp), lambda b, qi, ki: (b, ki, 0)),
                pl.BlockSpec((None, tk, hp), lambda b, qi, ki: (b, ki, 0)),
            ],
            out_specs=pl.BlockSpec((None, tq, head_dim),
                                   lambda b, qi, ki: (b, qi, 0)),
            scratch_shapes=[
                pltpu.VMEM((tq, 1), jnp.float32),   # running max
                pltpu.VMEM((tq, 1), jnp.float32),   # running denom
                pltpu.VMEM((tq, hp), jnp.float32),  # running accumulator
            ],
        ),
        compiler_params=params,
    )(q, k, v)


# ---------------------------------------------------------------------------
# Wrapper (== HeadAttention.forward, eval mode, mask=None)
# ---------------------------------------------------------------------------
def head_attention(x, wq, wk, wv, bq, bk, bv, *, tile=_DEFAULT_TILE):
    """x: (B, S, E) f32; w*: (E, H) f32; b*: (H,) f32. Returns (B, S, H) f32."""
    B, S, E = x.shape
    H = wq.shape[1]
    hp = max(LANE, _ceil_to(H, LANE))        # lane-dense padded head dim
    scale = 1.0 / math.sqrt(H)               # dim_k == head_dim in the module

    tq = tk = min(tile, _ceil_to(S, 8))
    s_pad = _ceil_to(S, tq)

    # Fold the softmax scale into the Q projection, fuse Q|K|V into one weight
    # slab, pad the head dim with zero columns / zero bias entries (keeps
    # padded q/k/v columns exactly zero so results are unchanged).
    def pad_w(w):
        return jnp.pad(w, ((0, 0), (0, hp - H)))

    def pad_b(b):
        return jnp.pad(b, (0, hp - H))

    w_qkv = jnp.concatenate(
        [pad_w(wq * scale), pad_w(wk), pad_w(wv)], axis=1).astype(jnp.bfloat16)
    b_qkv = jnp.concatenate(
        [pad_b(bq * scale), pad_b(bk), pad_b(bv)]).reshape(1, 3 * hp)
    b_qkv = b_qkv.astype(jnp.float32)

    xp = x if s_pad == S else jnp.pad(x, ((0, 0), (0, s_pad - S), (0, 0)))
    x_rows = xp.reshape(B * s_pad, E).astype(jnp.bfloat16)

    rows = B * s_pad                          # rows is a multiple of 8
    row_tile = rows if rows <= 256 else math.gcd(rows, 256)

    q2, k2, v2 = _qkv_project(x_rows, w_qkv, b_qkv, hp=hp, row_tile=row_tile)
    q3 = q2.reshape(B, s_pad, hp)
    k3 = k2.reshape(B, s_pad, hp)
    v3 = v2.reshape(B, s_pad, hp)

    out = _flash_attention(q3, k3, v3, head_dim=H, kv_len=S, tq=tq, tk=tk)
    return out if s_pad == S else out[:, :S, :]


def head_attention_ref(x, wq, wk, wv, bq, bk, bv):
    """Pure-JAX f32 reference mirroring the PyTorch forward (eval mode)."""
    q = x @ wq + bq
    k = x @ wk + bk
    v = x @ wv + bv
    scale = 1.0 / math.sqrt(q.shape[-1])
    scores = jnp.einsum("bqd,bkd->bqk", q, k) * scale
    w = jax.nn.softmax(scores, axis=-1)
    return jnp.einsum("bqk,bkd->bqd", w, v)


if __name__ == "__main__":
    # Small, module-consistent shapes: batch=2, seq=8, embed_dim=32, head_dim=16
    B, S, E, H = 2, 8, 32, 16

    key = jax.random.PRNGKey(0)
    kx, kwq, kwk, kwv, kbq, kbk, kbv = jax.random.split(key, 7)

    # Deterministic init mimicking nn.Linear's uniform(-1/sqrt(E), 1/sqrt(E)).
    bound = 1.0 / math.sqrt(E)
    x = jax.random.normal(kx, (B, S, E), dtype=jnp.float32)
    wq = jax.random.uniform(kwq, (E, H), jnp.float32, -bound, bound)
    wk = jax.random.uniform(kwk, (E, H), jnp.float32, -bound, bound)
    wv = jax.random.uniform(kwv, (E, H), jnp.float32, -bound, bound)
    bq = jax.random.uniform(kbq, (H,), jnp.float32, -bound, bound)
    bk = jax.random.uniform(kbk, (H,), jnp.float32, -bound, bound)
    bv = jax.random.uniform(kbv, (H,), jnp.float32, -bound, bound)

    out = head_attention(x, wq, wk, wv, bq, bk, bv)
    out = jax.block_until_ready(out)

    ref = head_attention_ref(x, wq, wk, wv, bq, bk, bv)
    assert out.shape == (B, S, H)
    # bf16 MXU inputs -> compare with loosened tolerance.
    assert jnp.allclose(out, ref, atol=3e-2, rtol=3e-2), "mismatch vs reference"

    print("KERNEL_OK")
</pallas_src>

<mosaic_0001>
module attributes {stable_mosaic.version = 11 : i64} {
  func.func @_qkv_proj_kernel(%arg0: i32, %arg1: memref<16x32xbf16, #tpu.memory_space<vmem>>, %arg2: memref<32x384xbf16, #tpu.memory_space<vmem>>, %arg3: memref<1x384xf32, #tpu.memory_space<vmem>>, %arg4: memref<16x128xbf16, #tpu.memory_space<vmem>>, %arg5: memref<16x128xbf16, #tpu.memory_space<vmem>>, %arg6: memref<16x128xbf16, #tpu.memory_space<vmem>>) attributes {dimension_semantics = [#tpu.dimension_semantics<parallel>], iteration_bounds = array<i64: 1>, scalar_prefetch = 0 : i64, scratch_operands = 0 : i64, tpu.core_type = #tpu.core_type<tc>, window_params = [{transform_indices = @transform_0, window_bounds = array<i64: 16, 32>}, {pipeline_mode = #tpu.pipeline_mode<synchronous>, transform_indices = @transform_1, window_bounds = array<i64: 32, 384>}, {pipeline_mode = #tpu.pipeline_mode<synchronous>, transform_indices = @transform_2, window_bounds = array<i64: 1, 384>}, {transform_indices = @transform_3, window_bounds = array<i64: 16, 128>}, {transform_indices = @transform_4, window_bounds = array<i64: 16, 128>}, {transform_indices = @transform_5, window_bounds = array<i64: 16, 128>}]} {
    %c0 = arith.constant 0 : index
    %c0_0 = arith.constant 0 : index
    %0 = vector.load %arg1[%c0, %c0_0] : memref<16x32xbf16, #tpu.memory_space<vmem>>, vector<16x32xbf16>
    %c0_1 = arith.constant 0 : index
    %c0_2 = arith.constant 0 : index
    %1 = vector.load %arg2[%c0_1, %c0_2] : memref<32x384xbf16, #tpu.memory_space<vmem>>, vector<32x384xbf16>
    %cst = arith.constant dense<0.000000e+00> : vector<16x384xf32>
    %2 = tpu.matmul %0, %1, %cst {dimension_numbers = #tpu.dot_dimension_numbers<[1], [0], [0], [1], [0, 0, 1, 1], [], []>} : vector<16x32xbf16>, vector<32x384xbf16>, vector<16x384xf32> -> vector<16x384xf32>
    %c0_3 = arith.constant 0 : index
    %c0_4 = arith.constant 0 : index
    %3 = vector.load %arg3[%c0_3, %c0_4] : memref<1x384xf32, #tpu.memory_space<vmem>>, vector<1x384xf32>
    %4 = vector.broadcast %3 : vector<1x384xf32> to vector<16x384xf32>
    %5 = arith.addf %2, %4 : vector<16x384xf32>
    %6 = vector.extract_strided_slice %5 {offsets = [0, 0], sizes = [16, 128], strides = [1, 1]} : vector<16x384xf32> to vector<16x128xf32>
    %7 = arith.truncf %6 : vector<16x128xf32> to vector<16x128xbf16>
    %c0_5 = arith.constant 0 : index
    %c0_6 = arith.constant 0 : index
    %8 = vector.load %arg4[%c0_5, %c0_6] : memref<16x128xbf16, #tpu.memory_space<vmem>>, vector<16x128xbf16>
    tpu.vector_store %arg4[%c0_5, %c0_6], %7 {strides = array<i32>} : memref<16x128xbf16, #tpu.memory_space<vmem>>, vector<16x128xbf16>,
    %9 = vector.extract_strided_slice %5 {offsets = [0, 128], sizes = [16, 128], strides = [1, 1]} : vector<16x384xf32> to vector<16x128xf32>
    %10 = arith.truncf %9 : vector<16x128xf32> to vector<16x128xbf16>
    %c0_7 = arith.constant 0 : index
    %c0_8 = arith.constant 0 : index
    %11 = vector.load %arg5[%c0_7, %c0_8] : memref<16x128xbf16, #tpu.memory_space<vmem>>, vector<16x128xbf16>
    tpu.vector_store %arg5[%c0_7, %c0_8], %10 {strides = array<i32>} : memref<16x128xbf16, #tpu.memory_space<vmem>>, vector<16x128xbf16>,
    %12 = vector.extract_strided_slice %5 {offsets = [0, 256], sizes = [16, 128], strides = [1, 1]} : vector<16x384xf32> to vector<16x128xf32>
    %13 = arith.truncf %12 : vector<16x128xf32> to vector<16x128xbf16>
    %c0_9 = arith.constant 0 : index
    %c0_10 = arith.constant 0 : index
    %14 = vector.load %arg6[%c0_9, %c0_10] : memref<16x128xbf16, #tpu.memory_space<vmem>>, vector<16x128xbf16>
    tpu.vector_store %arg6[%c0_9, %c0_10], %13 {strides = array<i32>} : memref<16x128xbf16, #tpu.memory_space<vmem>>, vector<16x128xbf16>,
    return
  }
  func.func @transform_0(%arg0: i32) -> (i32, i32) {
    %c0_i32 = arith.constant 0 : i32
    %c0_i32_0 = arith.constant 0 : i32
    return %arg0, %c0_i32 : i32, i32
  }
  func.func @transform_1(%arg0: i32) -> (i32, i32) {
    %c0_i32 = arith.constant 0 : i32
    %c0_i32_0 = arith.constant 0 : i32
    %c0_i32_1 = arith.constant 0 : i32
    return %c0_i32, %c0_i32_0 : i32, i32
  }
  func.func @transform_2(%arg0: i32) -> (i32, i32) {
    %c0_i32 = arith.constant 0 : i32
    %c0_i32_0 = arith.constant 0 : i32
    %c0_i32_1 = arith.constant 0 : i32
    return %c0_i32, %c0_i32_0 : i32, i32
  }
  func.func @transform_3(%arg0: i32) -> (i32, i32) {
    %c0_i32 = arith.constant 0 : i32
    %c0_i32_0 = arith.constant 0 : i32
    return %arg0, %c0_i32 : i32, i32
  }
  func.func @transform_4(%arg0: i32) -> (i32, i32) {
    %c0_i32 = arith.constant 0 : i32
    %c0_i32_0 = arith.constant 0 : i32
    return %arg0, %c0_i32 : i32, i32
  }
  func.func @transform_5(%arg0: i32) -> (i32, i32) {
    %c0_i32 = arith.constant 0 : i32
    %c0_i32_0 = arith.constant 0 : i32
    return %arg0, %c0_i32 : i32, i32
  }
}

module attributes {stable_mosaic.version = 11 : i64} {
  func.func @_qkv_proj_kernel(%arg0: i32, %arg1: memref<16x32xbf16, #tpu.memory_space<vmem>>, %arg2: memref<32x384xbf16, #tpu.memory_space<vmem>>, %arg3: memref<1x384xf32, #tpu.memory_space<vmem>>, %arg4: memref<16x128xbf16, #tpu.memory_space<vmem>>, %arg5: memref<16x128xbf16, #tpu.memory_space<vmem>>, %arg6: memref<16x128xbf16, #tpu.memory_space<vmem>>) attributes {dimension_semantics = [#tpu.dimension_semantics<parallel>], iteration_bounds = array<i64: 1>, scalar_prefetch = 0 : i64, scratch_operands = 0 : i64, tpu.core_type = #tpu.core_type<tc>, window_params = [{transform_indices = @transform_0, window_bounds = array<i64: 16, 32>}, {pipeline_mode = #tpu.pipeline_mode<synchronous>, transform_indices = @transform_1, window_bounds = array<i64: 32, 384>}, {pipeline_mode = #tpu.pipeline_mode<synchronous>, transform_indices = @transform_2, window_bounds = array<i64: 1, 384>}, {transform_indices = @transform_3, window_bounds = array<i64: 16, 128>}, {transform_indices = @transform_4, window_bounds = array<i64: 16, 128>}, {transform_indices = @transform_5, window_bounds = array<i64: 16, 128>}]} {
    %c0 = arith.constant 0 : index
    %c0_0 = arith.constant 0 : index
    %0 = vector.load %arg1[%c0, %c0_0] : memref<16x32xbf16, #tpu.memory_space<vmem>>, vector<16x32xbf16>
    %c0_1 = arith.constant 0 : index
    %c0_2 = arith.constant 0 : index
    %1 = vector.load %arg2[%c0_1, %c0_2] : memref<32x384xbf16, #tpu.memory_space<vmem>>, vector<32x384xbf16>
    %cst = arith.constant dense<0.000000e+00> : vector<16x384xf32>
    %2 = tpu.matmul %0, %1, %cst {dimension_numbers = #tpu.dot_dimension_numbers<[1], [0], [0], [1], [0, 0, 1, 1], [], []>} : vector<16x32xbf16>, vector<32x384xbf16>, vector<16x384xf32> -> vector<16x384xf32>
    %c0_3 = arith.constant 0 : index
    %c0_4 = arith.constant 0 : index
    %3 = vector.load %arg3[%c0_3, %c0_4] : memref<1x384xf32, #tpu.memory_space<vmem>>, vector<1x384xf32>
    %4 = vector.broadcast %3 : vector<1x384xf32> to vector<16x384xf32>
    %5 = arith.addf %2, %4 : vector<16x384xf32>
    %6 = vector.extract_strided_slice %5 {offsets = [0, 0], sizes = [16, 128], strides = [1, 1]} : vector<16x384xf32> to vector<16x128xf32>
    %7 = arith.truncf %6 : vector<16x128xf32> to vector<16x128xbf16>
    %c0_5 = arith.constant 0 : index
    %c0_6 = arith.constant 0 : index
    %8 = vector.load %arg4[%c0_5, %c0_6] : memref<16x128xbf16, #tpu.memory_space<vmem>>, vector<16x128xbf16>
    tpu.vector_store %arg4[%c0_5, %c0_6], %7 {strides = array<i32>} : memref<16x128xbf16, #tpu.memory_space<vmem>>, vector<16x128xbf16>,
    %9 = vector.extract_strided_slice %5 {offsets = [0, 128], sizes = [16, 128], strides = [1, 1]} : vector<16x384xf32> to vector<16x128xf32>
    %10 = arith.truncf %9 : vector<16x128xf32> to vector<16x128xbf16>
    %c0_7 = arith.constant 0 : index
    %c0_8 = arith.constant 0 : index
    %11 = vector.load %arg5[%c0_7, %c0_8] : memref<16x128xbf16, #tpu.memory_space<vmem>>, vector<16x128xbf16>
    tpu.vector_store %arg5[%c0_7, %c0_8], %10 {strides = array<i32>} : memref<16x128xbf16, #tpu.memory_space<vmem>>, vector<16x128xbf16>,
    %12 = vector.extract_strided_slice %5 {offsets = [0, 256], sizes = [16, 128], strides = [1, 1]} : vector<16x384xf32> to vector<16x128xf32>
    %13 = arith.truncf %12 : vector<16x128xf32> to vector<16x128xbf16>
    %c0_9 = arith.constant 0 : index
    %c0_10 = arith.constant 0 : index
    %14 = vector.load %arg6[%c0_9, %c0_10] : memref<16x128xbf16, #tpu.memory_space<vmem>>, vector<16x128xbf16>
    tpu.vector_store %arg6[%c0_9, %c0_10], %13 {strides = array<i32>} : memref<16x128xbf16, #tpu.memory_space<vmem>>, vector<16x128xbf16>,
    return
  }
  func.func @transform_0(%arg0: i32) -> (i32, i32) {
    %c0_i32 = arith.constant 0 : i32
    %c0_i32_0 = arith.constant 0 : i32
    return %arg0, %c0_i32 : i32, i32
  }
  func.func @transform_1(%arg0: i32) -> (i32, i32) {
    %c0_i32 = arith.constant 0 : i32
    %c0_i32_0 = arith.constant 0 : i32
    %c0_i32_1 = arith.constant 0 : i32
    return %c0_i32, %c0_i32_0 : i32, i32
  }
  func.func @transform_2(%arg0: i32) -> (i32, i32) {
    %c0_i32 = arith.constant 0 : i32
    %c0_i32_0 = arith.constant 0 : i32
    %c0_i32_1 = arith.constant 0 : i32
    return %c0_i32, %c0_i32_0 : i32, i32
  }
  func.func @transform_3(%arg0: i32) -> (i32, i32) {
    %c0_i32 = arith.constant 0 : i32
    %c0_i32_0 = arith.constant 0 : i32
    return %arg0, %c0_i32 : i32, i32
  }
  func.func @transform_4(%arg0: i32) -> (i32, i32) {
    %c0_i32 = arith.constant 0 : i32
    %c0_i32_0 = arith.constant 0 : i32
    return %arg0, %c0_i32 : i32, i32
  }
  func.func @transform_5(%arg0: i32) -> (i32, i32) {
    %c0_i32 = arith.constant 0 : i32
    %c0_i32_0 = arith.constant 0 : i32
    return %arg0, %c0_i32 : i32, i32
  }
}

</mosaic_0001>

<bundles_post_ra>
// kernel: tpu_custom_call.1
= control target key start
LH: loop header
LB: loop body
LE: loop exit
PB: predicated region body
PF: predicated region fallthrough
CT: control target
= control target key end

     0   :  { %11 = vsyncpa [#allocation3], 0  ;;  %s596_s0 = inlined_call_operand.hbm [shape: bf16[16,32], index: 0, kind: input, shape index: {}]   ;;  %s597_s1 = inlined_call_operand.hbm [shape: bf16[32,384], index: 1, kind: input, shape index: {}]   ;;  %s598_s2 = inlined_call_operand.vmem [shape: f32[1,384], index: 2, kind: input, shape index: {}]   ;;  %s599_s3 = inlined_call_operand.hbm [shape: bf16[16,128], index: 3, kind: output, shape index: {0}]   ;;  %s600_s4 = inlined_call_operand.hbm [shape: bf16[16,128], index: 4, kind: output, shape index: {1}]   ;;  %s601_s5 = inlined_call_operand.hbm [shape: bf16[16,128], index: 5, kind: output, shape index: {2}]  }
   0x1   :  { %12 = vsyncpa [#allocation6], 0 }
   0x2   :  { %13 = vsyncpa [#allocation4], 0 }
   0x3   :  { %14 = vsyncpa [#allocation9], 0  ;;  %s465_s18 = smov [#allocation2]   ;;  %s347_s22 = scalar_lea.hbm %s596_s0, 128 }
   0x4   :  { %s20_s19 = sshll.u32 %s465_s18, 4  ;;  %p348_p0 = scmp.ne.s32.totalorder %s596_s0, %s347_s22  ;;  %s21_s19 = int_to_ptr.vmem [resolvable:$true] %s20_s19 }
   0x5   :  { %p351_p1 = scmp.lt.u32.totalorder %s347_s22, %s596_s0 }
   0x7   :  { %p353_p2 = pnand %p351_p1, %p348_p0 }
   0x9   :  { %356 = shalt.err (!%p353_p2)
}
   0xa   :  { %s357_s27 = scalar_lea.vmem %s21_s19, 128  ;;  %p362_p4 = scmp.lt.s32.totalorder %s21_s19, %s21_s19 }
   0xb   :  { %p358_p3 = scmp.ne.s32.totalorder %s21_s19, %s357_s27  ;;  %p363_p5 = scmp.lt.s32.totalorder %s357_s27, %s357_s27 }
   0xd   :  { %p364_p6 = por %p363_p5, %p362_p4 }
   0xf   :  { %p365_p7 = pnand %p364_p6, %p358_p3 }
  0x11   :  { %368 = shalt.err (!%p365_p7)
}
  0x12   :  { %s466_s28 = smov 64   ;;  %s467_s29 = smov 4  }
  0x13   :  { %26 = dma.hbm_to_vmem [thread:$0]  %s596_s0, 128, %s21_s19, [#allocation3], %s466_s28, %s466_s28, %s467_s29  }
  0x14   :  { %s468_s7 = smov [#allocation5]   ;;  %s369_s11 = scalar_lea.hbm %s597_s1, 768 }
  0x15   :  { %s32_s8 = sshll.u32 %s468_s7, 4  ;;  %p370_p8 = scmp.ne.s32.totalorder %s597_s1, %s369_s11  ;;  %s33_s8 = int_to_ptr.vmem [resolvable:$true] %s32_s8 }
  0x16   :  { %p373_p9 = scmp.lt.u32.totalorder %s369_s11, %s597_s1 }
  0x18   :  { %p375_p10 = pnand %p373_p9, %p370_p8 }
  0x1a   :  { %378 = shalt.err (!%p375_p10)
}
  0x1b   :  { %s379_s16 = scalar_lea.vmem %s33_s8, 768  ;;  %p384_p12 = scmp.lt.s32.totalorder %s33_s8, %s33_s8 }
  0x1c   :  { %p380_p11 = scmp.ne.s32.totalorder %s33_s8, %s379_s16  ;;  %p385_p13 = scmp.lt.s32.totalorder %s379_s16, %s379_s16 }
  0x1e   :  { %p386_p0 = por %p385_p13, %p384_p12 }
  0x20   :  { %p387_p1 = pnand %p386_p0, %p380_p11 }
  0x22   :  { %390 = shalt.err (!%p387_p1)
}
  0x23   :  { %s469_s0 = smov 192   ;;  %s470_s17 = smov 12  }
  0x24   :  { %38 = dma.hbm_to_vmem [thread:$0]  %s597_s1, 768, %s33_s8, [#allocation6], %s469_s0, %s469_s0, %s470_s17  }
  0x25   :  { %457 = dma.done.wait [#allocation3], 128  }
  0x26   :  { %458 = vsyncadd [#allocation3], 4294967168 }
  0x27   :  { %459 = dma.done.wait [#allocation6], 768  }
  0x28   :  { %460 = vsyncadd [#allocation6], 4294966528  ;;  %v471_v0 = vmov 0.0   ;;  %vm472_vm0 = vmmov 0   ;;  %v473_v1 = vmov 0   ;;  %v346_v8 = vld [vmem:[#allocation2] sm:$0xff]   ;;  %v60_v9 = vlaneseq }
  0x29   :  { %318 = vmatprep.subr.bf16.mxu1 %v471_v0  ;;  %322 = vmatprep.mubr.msk.bf16.mxu1 %vm472_vm0, %v471_v0  ;;  %v338_v2 = vld [vmem:[#allocation5 + $0x4] ss:$12 sps:$4 sm:$0xff]   ;;  %v340_v3 = vld [vmem:[#allocation5 + $0x8] ss:$12 sps:$4 sm:$0xff]   ;;  %v341_v4 = vld [vmem:[#allocation5] ss:$12 sps:$4 sm:$0xff]  }
  0x2a   :  { %148 = vmatprep.mubr.bf16.mxu0 %v473_v1  ;;  %116 = vmatprep.subr.bf16.mxu0 %v338_v2  ;;  %v342_v5 = vld [vmem:[#allocation5 + $0x1c] ss:$12 sps:$4 sm:$0xff]   ;;  %v344_v6 = vld [vmem:[#allocation5 + $0x20] ss:$12 sps:$4 sm:$0xff]   ;;  %v345_v7 = vld [vmem:[#allocation5 + $0x18] ss:$12 sps:$4 sm:$0xff]  }
  0x2b   :  { %319 = vmatpush3.bf16.msra.mxu1 %v340_v3  ;;  %117 = vmatpush1.bf16.msra.mxu0 %v341_v4  ;;  %vm112_vm1 = vcmask 261120   ;;  %v61_v10 = vshrl.u32 %v60_v9, 7  ;;  %v58_v12 = vld [vmem:[%s598_s2] sm:$0x7]  ;;  %s474_s21 = smov [#allocation7]   ;;  %s475_s2 = smov [#allocation8]  }
  0x2c   :  { %320 = vmatprep.subr.bf16.mxu1 %v471_v0  ;;  %118 = vmatprep.subr.bf16.mxu0 %v342_v5  ;;  %s235_s22 = sshll.u32 %s474_s21, 4  ;;  %s247_s23 = sshll.u32 %s475_s2, 4  ;;  %s236_s22 = int_to_ptr.vmem [resolvable:$true] %s235_s22  ;;  %s537_s23 = int_to_ptr.vmem [resolvable:$true] %s247_s23 }
  0x2d   :  { %v70_v11 = vsub.s32 2, %v61_v10  ;;  %v62_v13 = vsub.s32 0, %v61_v10  ;;  %v66_v15 = vsub.s32 1, %v61_v10  ;;  %s476_s24 = smov [#allocation10]   ;;  %s391_s26 = scalar_lea.vmem %s236_s22, 128 }
  0x2e   :  { %s259_s25 = sshll.u32 %s476_s24, 4  ;;  %p392_p2 = scmp.ne.s32.totalorder %s236_s22, %s391_s26  ;;  %s539_s25 = int_to_ptr.vmem [resolvable:$true] %s259_s25 }
  0x2f   :  { %321 = vmatpush3.bf16.msra.mxu1 %v344_v6  ;;  %119 = vmatpush1.bf16.msra.mxu0 %v345_v7  ;;  %v71_v14 = vrot.slane %v58_v12, %v70_v11  ;;  %v63_v17 = vrot.slane %v58_v12, %v62_v13  ;;  %v67_v21 = vrot.slane %v58_v12, %v66_v15  ;;  %p396_p3 = scmp.lt.s32.totalorder %s236_s22, %s236_s22  ;;  %p397_p4 = scmp.lt.s32.totalorder %s391_s26, %s391_s26 }
  0x31   :  { %p398_p5 = por %p397_p4, %p396_p3 }
  0x32   :  { %323 = vmatmul.mubr.msk.bf16.vlgmr.msra.gmra.mrb[0].mxu1 %vm112_vm1, %v346_v8  ;;  %286 = vmatmul.mubr.msk.bf16.vlgmr.msra.gmra.mrb[0].mxu0 %vm112_vm1, %v346_v8 }
  0x33   :  { %p399_p6 = pnand %p398_p5, %p392_p2 }
 0x105   :  { %v193_v16 = vpop.f32.mrb[0].mxu1  ;;  %v150_v19 = vpop.f32.mrb[0].mxu0 }
 0x106   :  { %v194_v18 = vadd.f32 %v193_v16, %v71_v14  ;;  %v324_v20 = vpop.f32.mrb[1].mxu1  ;;  %v152_v22 = vpop.f32.mrb[1].mxu0  ;;  %v151_v27 = vadd.f32 %v150_v19, %v63_v17 }
 0x107   :  { %v196_v23 = vpop.f32.mrb[2].mxu1  ;;  %v154_v25 = vpop.f32.mrb[2].mxu0  ;;  %v153_v30 = vadd.f32 %v152_v22, %v67_v21 }
 0x108   :  { %v197_v24 = vadd.f32 %v196_v23, %v71_v14  ;;  %v325_v26 = vpop.f32.mrb[3].mxu1  ;;  %v155_v28 = vadd.f32 %v154_v25, %v63_v17  ;;  %v156_v29 = vpop.f32.mrb[3].mxu0 }
 0x109   :  { %v157_v32 = vadd.f32 %v156_v29, %v67_v21 }
 0x10a   :  { %v313_v31 = vpack.c.bf16 %v197_v24, %v194_v18  ;;  %v303_v33 = vpack.c.bf16 %v155_v28, %v151_v27 }
 0x10b   :  { %v308_v34 = vpack.c.bf16 %v157_v32, %v153_v30 }
 0x10c   :  { %314 = vst [vmem:[#allocation10] sm:$0xff] %v313_v31   ;;  %304 = vst [vmem:[#allocation7] sm:$0xff] %v303_v33  }
 0x10d   :  { %309 = vst [vmem:[#allocation8] sm:$0xff] %v308_v34  }
 0x10e   :  { %402 = shalt.err (!%p399_p6)
}
 0x10f   :  { %s403_s6 = scalar_lea.hbm %s599_s3, 128 }
 0x110   :  { %p404_p7 = scmp.ne.s32.totalorder %s599_s3, %s403_s6  ;;  %p407_p8 = scmp.lt.u32.totalorder %s403_s6, %s599_s3 }
 0x112   :  { %p409_p9 = pnand %p407_p8, %p404_p7 }
 0x114   :  { %412 = shalt.err (!%p409_p9)
}
 0x115   :  { %241 = dma.vmem_to_hbm [thread:$0]  %s236_s22, 128, %s599_s3, [#allocation4], %s466_s28, %s466_s28, %s467_s29  }
 0x116   :  { %s413_s13 = scalar_lea.vmem %s537_s23, 128  ;;  %p418_p11 = scmp.lt.s32.totalorder %s537_s23, %s537_s23 }
 0x117   :  { %p414_p10 = scmp.ne.s32.totalorder %s537_s23, %s413_s13  ;;  %p419_p12 = scmp.lt.s32.totalorder %s413_s13, %s413_s13 }
 0x119   :  { %p420_p13 = por %p419_p12, %p418_p11 }
 0x11b   :  { %p421_p0 = pnand %p420_p13, %p414_p10 }
 0x11d   :  { %424 = shalt.err (!%p421_p0)
}
 0x11e   :  { %s425_s16 = scalar_lea.hbm %s600_s4, 128 }
 0x11f   :  { %p426_p1 = scmp.ne.s32.totalorder %s600_s4, %s425_s16  ;;  %p429_p2 = scmp.lt.u32.totalorder %s425_s16, %s600_s4 }
 0x121   :  { %p431_p3 = pnand %p429_p2, %p426_p1 }
 0x123   :  { %434 = shalt.err (!%p431_p3)
}
 0x124   :  { %253 = dma.vmem_to_hbm [thread:$0]  %s537_s23, 128, %s600_s4, [#allocation9], %s466_s28, %s466_s28, %s467_s29  }
 0x125   :  { %s435_s20 = scalar_lea.vmem %s539_s25, 128  ;;  %p440_p5 = scmp.lt.s32.totalorder %s539_s25, %s539_s25 }
 0x126   :  { %p436_p4 = scmp.ne.s32.totalorder %s539_s25, %s435_s20  ;;  %p441_p6 = scmp.lt.s32.totalorder %s435_s20, %s435_s20 }
 0x128   :  { %p442_p7 = por %p441_p6, %p440_p5 }
 0x12a   :  { %p443_p8 = pnand %p442_p7, %p436_p4 }
 0x12c   :  { %446 = shalt.err (!%p443_p8)
}
 0x12d   :  { %s447_s2 = scalar_lea.hbm %s601_s5, 128 }
 0x12e   :  { %p448_p9 = scmp.ne.s32.totalorder %s601_s5, %s447_s2  ;;  %p451_p10 = scmp.lt.u32.totalorder %s447_s2, %s601_s5 }
 0x130   :  { %p453_p11 = pnand %p451_p10, %p448_p9 }
 0x132   :  { %456 = shalt.err (!%p453_p11)
}
 0x133   :  { %265 = dma.vmem_to_hbm [thread:$0]  %s539_s25, 128, %s601_s5, [#allocation9], %s466_s28, %s466_s28, %s467_s29  }
 0x134   :  { %461 = dma.done.wait [#allocation4], 128  }
 0x135   :  { %462 = vsyncadd [#allocation4], 4294967168 }
 0x136   :  { %463 = dma.done.wait [#allocation9], 256  }
 0x137   :  { %464 = vsyncadd [#allocation9], 4294967040 }
 0x138   :  { %275 = vsyncpa [#allocation3], 1 }
 0x139   :  { %276 = vsyncpa [#allocation6], 1 }
 0x13a   :  { %277 = vsyncpa [#allocation4], 1 }
 0x13b   :  { %278 = vsyncpa [#allocation9], 1 }

// kernel: tpu_custom_call.1
= control target key start
LH: loop header
LB: loop body
LE: loop exit
PB: predicated region body
PF: predicated region fallthrough
CT: control target
= control target key end

     0   :  { %11 = vsyncpa [#allocation3], 0  ;;  %s596_s0 = inlined_call_operand.hbm [shape: bf16[16,32], index: 0, kind: input, shape index: {}]   ;;  %s597_s1 = inlined_call_operand.hbm [shape: bf16[32,384], index: 1, kind: input, shape index: {}]   ;;  %s598_s2 = inlined_call_operand.vmem [shape: f32[1,384], index: 2, kind: input, shape index: {}]   ;;  %s599_s3 = inlined_call_operand.hbm [shape: bf16[16,128], index: 3, kind: output, shape index: {0}]   ;;  %s600_s4 = inlined_call_operand.hbm [shape: bf16[16,128], index: 4, kind: output, shape index: {1}]   ;;  %s601_s5 = inlined_call_operand.hbm [shape: bf16[16,128], index: 5, kind: output, shape index: {2}]  }
   0x1   :  { %12 = vsyncpa [#allocation6], 0 }
   0x2   :  { %13 = vsyncpa [#allocation4], 0 }
   0x3   :  { %14 = vsyncpa [#allocation9], 0  ;;  %s465_s18 = smov [#allocation2]   ;;  %s347_s22 = scalar_lea.hbm %s596_s0, 128 }
   0x4   :  { %s20_s19 = sshll.u32 %s465_s18, 4  ;;  %p348_p0 = scmp.ne.s32.totalorder %s596_s0, %s347_s22  ;;  %s21_s19 = int_to_ptr.vmem [resolvable:$true] %s20_s19 }
   0x5   :  { %p351_p1 = scmp.lt.u32.totalorder %s347_s22, %s596_s0 }
   0x7   :  { %p353_p2 = pnand %p351_p1, %p348_p0 }
   0x9   :  { %356 = shalt.err (!%p353_p2)
}
   0xa   :  { %s357_s27 = scalar_lea.vmem %s21_s19, 128  ;;  %p362_p4 = scmp.lt.s32.totalorder %s21_s19, %s21_s19 }
   0xb   :  { %p358_p3 = scmp.ne.s32.totalorder %s21_s19, %s357_s27  ;;  %p363_p5 = scmp.lt.s32.totalorder %s357_s27, %s357_s27 }
   0xd   :  { %p364_p6 = por %p363_p5, %p362_p4 }
   0xf   :  { %p365_p7 = pnand %p364_p6, %p358_p3 }
  0x11   :  { %368 = shalt.err (!%p365_p7)
}
  0x12   :  { %s466_s28 = smov 64   ;;  %s467_s29 = smov 4  }
  0x13   :  { %26 = dma.hbm_to_vmem [thread:$0]  %s596_s0, 128, %s21_s19, [#allocation3], %s466_s28, %s466_s28, %s467_s29  }
  0x14   :  { %s468_s7 = smov [#allocation5]   ;;  %s369_s11 = scalar_lea.hbm %s597_s1, 768 }
  0x15   :  { %s32_s8 = sshll.u32 %s468_s7, 4  ;;  %p370_p8 = scmp.ne.s32.totalorder %s597_s1, %s369_s11  ;;  %s33_s8 = int_to_ptr.vmem [resolvable:$true] %s32_s8 }
  0x16   :  { %p373_p9 = scmp.lt.u32.totalorder %s369_s11, %s597_s1 }
  0x18   :  { %p375_p10 = pnand %p373_p9, %p370_p8 }
  0x1a   :  { %378 = shalt.err (!%p375_p10)
}
  0x1b   :  { %s379_s16 = scalar_lea.vmem %s33_s8, 768  ;;  %p384_p12 = scmp.lt.s32.totalorder %s33_s8, %s33_s8 }
  0x1c   :  { %p380_p11 = scmp.ne.s32.totalorder %s33_s8, %s379_s16  ;;  %p385_p13 = scmp.lt.s32.totalorder %s379_s16, %s379_s16 }
  0x1e   :  { %p386_p0 = por %p385_p13, %p384_p12 }
  0x20   :  { %p387_p1 = pnand %p386_p0, %p380_p11 }
  0x22   :  { %390 = shalt.err (!%p387_p1)
}
  0x23   :  { %s469_s0 = smov 192   ;;  %s470_s17 = smov 12  }
  0x24   :  { %38 = dma.hbm_to_vmem [thread:$0]  %s597_s1, 768, %s33_s8, [#allocation6], %s469_s0, %s469_s0, %s470_s17  }
  0x25   :  { %457 = dma.done.wait [#allocation3], 128  }
  0x26   :  { %458 = vsyncadd [#allocation3], 4294967168 }
  0x27   :  { %459 = dma.done.wait [#allocation6], 768  }
  0x28   :  { %460 = vsyncadd [#allocation6], 4294966528  ;;  %v471_v0 = vmov 0.0   ;;  %vm472_vm0 = vmmov 0   ;;  %v473_v1 = vmov 0   ;;  %v346_v8 = vld [vmem:[#allocation2] sm:$0xff]   ;;  %v60_v9 = vlaneseq }
  0x29   :  { %318 = vmatprep.subr.bf16.mxu1 %v471_v0  ;;  %322 = vmatprep.mubr.msk.bf16.mxu1 %vm472_vm0, %v471_v0  ;;  %v338_v2 = vld [vmem:[#allocation5 + $0x4] ss:$12 sps:$4 sm:$0xff]   ;;  %v340_v3 = vld [vmem:[#allocation5 + $0x8] ss:$12 sps:$4 sm:$0xff]   ;;  %v341_v4 = vld [vmem:[#allocation5] ss:$12 sps:$4 sm:$0xff]  }
  0x2a   :  { %148 = vmatprep.mubr.bf16.mxu0 %v473_v1  ;;  %116 = vmatprep.subr.bf16.mxu0 %v338_v2  ;;  %v342_v5 = vld [vmem:[#allocation5 + $0x1c] ss:$12 sps:$4 sm:$0xff]   ;;  %v344_v6 = vld [vmem:[#allocation5 + $0x20] ss:$12 sps:$4 sm:$0xff]   ;;  %v345_v7 = vld [vmem:[#allocation5 + $0x18] ss:$12 sps:$4 sm:$0xff]  }
  0x2b   :  { %319 = vmatpush3.bf16.msra.mxu1 %v340_v3  ;;  %117 = vmatpush1.bf16.msra.mxu0 %v341_v4  ;;  %vm112_vm1 = vcmask 261120   ;;  %v61_v10 = vshrl.u32 %v60_v9, 7  ;;  %v58_v12 = vld [vmem:[%s598_s2] sm:$0x7]  ;;  %s474_s21 = smov [#allocation7]   ;;  %s475_s2 = smov [#allocation8]  }
  0x2c   :  { %320 = vmatprep.subr.bf16.mxu1 %v471_v0  ;;  %118 = vmatprep.subr.bf16.mxu0 %v342_v5  ;;  %s235_s22 = sshll.u32 %s474_s21, 4  ;;  %s247_s23 = sshll.u32 %s475_s2, 4  ;;  %s236_s22 = int_to_ptr.vmem [resolvable:$true] %s235_s22  ;;  %s537_s23 = int_to_ptr.vmem [resolvable:$true] %s247_s23 }
  0x2d   :  { %v70_v11 = vsub.s32 2, %v61_v10  ;;  %v62_v13 = vsub.s32 0, %v61_v10  ;;  %v66_v15 = vsub.s32 1, %v61_v10  ;;  %s476_s24 = smov [#allocation10]   ;;  %s391_s26 = scalar_lea.vmem %s236_s22, 128 }
  0x2e   :  { %s259_s25 = sshll.u32 %s476_s24, 4  ;;  %p392_p2 = scmp.ne.s32.totalorder %s236_s22, %s391_s26  ;;  %s539_s25 = int_to_ptr.vmem [resolvable:$true] %s259_s25 }
  0x2f   :  { %321 = vmatpush3.bf16.msra.mxu1 %v344_v6  ;;  %119 = vmatpush1.bf16.msra.mxu0 %v345_v7  ;;  %v71_v14 = vrot.slane %v58_v12, %v70_v11  ;;  %v63_v17 = vrot.slane %v58_v12, %v62_v13  ;;  %v67_v21 = vrot.slane %v58_v12, %v66_v15  ;;  %p396_p3 = scmp.lt.s32.totalorder %s236_s22, %s236_s22  ;;  %p397_p4 = scmp.lt.s32.totalorder %s391_s26, %s391_s26 }
  0x31   :  { %p398_p5 = por %p397_p4, %p396_p3 }
  0x32   :  { %323 = vmatmul.mubr.msk.bf16.vlgmr.msra.gmra.mrb[0].mxu1 %vm112_vm1, %v346_v8  ;;  %286 = vmatmul.mubr.msk.bf16.vlgmr.msra.gmra.mrb[0].mxu0 %vm112_vm1, %v346_v8 }
  0x33   :  { %p399_p6 = pnand %p398_p5, %p392_p2 }
 0x105   :  { %v193_v16 = vpop.f32.mrb[0].mxu1  ;;  %v150_v19 = vpop.f32.mrb[0].mxu0 }
 0x106   :  { %v194_v18 = vadd.f32 %v193_v16, %v71_v14  ;;  %v324_v20 = vpop.f32.mrb[1].mxu1  ;;  %v152_v22 = vpop.f32.mrb[1].mxu0  ;;  %v151_v27 = vadd.f32 %v150_v19, %v63_v17 }
 0x107   :  { %v196_v23 = vpop.f32.mrb[2].mxu1  ;;  %v154_v25 = vpop.f32.mrb[2].mxu0  ;;  %v153_v30 = vadd.f32 %v152_v22, %v67_v21 }
 0x108   :  { %v197_v24 = vadd.f32 %v196_v23, %v71_v14  ;;  %v325_v26 = vpop.f32.mrb[3].mxu1  ;;  %v155_v28 = vadd.f32 %v154_v25, %v63_v17  ;;  %v156_v29 = vpop.f32.mrb[3].mxu0 }
 0x109   :  { %v157_v32 = vadd.f32 %v156_v29, %v67_v21 }
 0x10a   :  { %v313_v31 = vpack.c.bf16 %v197_v24, %v194_v18  ;;  %v303_v33 = vpack.c.bf16 %v155_v28, %v151_v27 }
 0x10b   :  { %v308_v34 = vpack.c.bf16 %v157_v32, %v153_v30 }
 0x10c   :  { %314 = vst [vmem:[#allocation10] sm:$0xff] %v313_v31   ;;  %304 = vst [vmem:[#allocation7] sm:$0xff] %v303_v33  }
 0x10d   :  { %309 = vst [vmem:[#allocation8] sm:$0xff] %v308_v34  }
 0x10e   :  { %402 = shalt.err (!%p399_p6)
}
 0x10f   :  { %s403_s6 = scalar_lea.hbm %s599_s3, 128 }
 0x110   :  { %p404_p7 = scmp.ne.s32.totalorder %s599_s3, %s403_s6  ;;  %p407_p8 = scmp.lt.u32.totalorder %s403_s6, %s599_s3 }
 0x112   :  { %p409_p9 = pnand %p407_p8, %p404_p7 }
 0x114   :  { %412 = shalt.err (!%p409_p9)
}
 0x115   :  { %241 = dma.vmem_to_hbm [thread:$0]  %s236_s22, 128, %s599_s3, [#allocation4], %s466_s28, %s466_s28, %s467_s29  }
 0x116   :  { %s413_s13 = scalar_lea.vmem %s537_s23, 128  ;;  %p418_p11 = scmp.lt.s32.totalorder %s537_s23, %s537_s23 }
 0x117   :  { %p414_p10 = scmp.ne.s32.totalorder %s537_s23, %s413_s13  ;;  %p419_p12 = scmp.lt.s32.totalorder %s413_s13, %s413_s13 }
 0x119   :  { %p420_p13 = por %p419_p12, %p418_p11 }
 0x11b   :  { %p421_p0 = pnand %p420_p13, %p414_p10 }
 0x11d   :  { %424 = shalt.err (!%p421_p0)
}
 0x11e   :  { %s425_s16 = scalar_lea.hbm %s600_s4, 128 }
 0x11f   :  { %p426_p1 = scmp.ne.s32.totalorder %s600_s4, %s425_s16  ;;  %p429_p2 = scmp.lt.u32.totalorder %s425_s16, %s600_s4 }
 0x121   :  { %p431_p3 = pnand %p429_p2, %p426_p1 }
 0x123   :  { %434 = shalt.err (!%p431_p3)
}
 0x124   :  { %253 = dma.vmem_to_hbm [thread:$0]  %s537_s23, 128, %s600_s4, [#allocation9], %s466_s28, %s466_s28, %s467_s29  }
 0x125   :  { %s435_s20 = scalar_lea.vmem %s539_s25, 128  ;;  %p440_p5 = scmp.lt.s32.totalorder %s539_s25, %s539_s25 }
 0x126   :  { %p436_p4 = scmp.ne.s32.totalorder %s539_s25, %s435_s20  ;;  %p441_p6 = scmp.lt.s32.totalorder %s435_s20, %s435_s20 }
 0x128   :  { %p442_p7 = por %p441_p6, %p440_p5 }
 0x12a   :  { %p443_p8 = pnand %p442_p7, %p436_p4 }
 0x12c   :  { %446 = shalt.err (!%p443_p8)
}
 0x12d   :  { %s447_s2 = scalar_lea.hbm %s601_s5, 128 }
 0x12e   :  { %p448_p9 = scmp.ne.s32.totalorder %s601_s5, %s447_s2  ;;  %p451_p10 = scmp.lt.u32.totalorder %s447_s2, %s601_s5 }
 0x130   :  { %p453_p11 = pnand %p451_p10, %p448_p9 }
 0x132   :  { %456 = shalt.err (!%p453_p11)
}
 0x133   :  { %265 = dma.vmem_to_hbm [thread:$0]  %s539_s25, 128, %s601_s5, [#allocation9], %s466_s28, %s466_s28, %s467_s29  }
 0x134   :  { %461 = dma.done.wait [#allocation4], 128  }
 0x135   :  { %462 = vsyncadd [#allocation4], 4294967168 }
 0x136   :  { %463 = dma.done.wait [#allocation9], 256  }
 0x137   :  { %464 = vsyncadd [#allocation9], 4294967040 }
 0x138   :  { %275 = vsyncpa [#allocation3], 1 }
 0x139   :  { %276 = vsyncpa [#allocation6], 1 }
 0x13a   :  { %277 = vsyncpa [#allocation4], 1 }
 0x13b   :  { %278 = vsyncpa [#allocation9], 1 }

</bundles_post_ra>
